<compile_context>
chip_gen: v6e
topology: v6e:2x2x1
jax: 0.10.0
libtpu: 0.0.40
codegen_flags: <defaults>
</compile_context>

<pallas_src>
import functools

import jax
import jax.numpy as jnp
from jax import lax
from jax.experimental import pallas as pl
from jax.experimental.pallas import tpu as pltpu


def _attentive_pool_kernel(
    lens_ref,        # VMEM (Bb, 1, 1) int32 — sequence lengths for this block
    x_ref,           # VMEM (Bb, T, C) f32
    w1x_ref,         # VMEM (C, A) bf16 — conv1 weight, x slice
    w1m_ref,         # VMEM (C, A) bf16 — conv1 weight, mean slice
    w1s_ref,         # VMEM (C, A) bf16 — conv1 weight, std slice
    b1_ref,          # VMEM (1, A) f32
    bn_scale_ref,    # VMEM (1, A) f32 — folded inference BN scale
    bn_shift_ref,    # VMEM (1, A) f32 — folded inference BN shift
    w2_ref,          # VMEM (A, C) bf16
    b2_ref,          # VMEM (1, C) f32
    out_ref,         # VMEM (Bb, 1, 2C) f32
    *,
    eps: float,
):
    x = x_ref[...]                                            # (Bb, T, C) f32
    Bb, T, C = x.shape
    A = w1x_ref.shape[1]

    # --- lens_to_mask --------------------------------------------------------
    t_idx = lax.broadcasted_iota(jnp.int32, (Bb, T, 1), 1)    # (Bb, T, 1)
    seq_len = lens_ref[...]                                   # (Bb, 1, 1)
    mask = (t_idx < seq_len).astype(jnp.float32)              # (Bb, T, 1)
    num = jnp.sum(mask, axis=1, keepdims=True)                # (Bb, 1, 1)
    num = jnp.maximum(num, 1.0)                               # guard zero-length rows
    m = mask * pl.reciprocal(num, approx=True)                # (Bb, T, 1)

    # --- masked mean/std via single-pass moments -----------------------------
    mean = jnp.sum(m * x, axis=1)                             # (Bb, C)
    ex2 = jnp.sum(m * x * x, axis=1)                          # (Bb, C)
    std = jnp.sqrt(jnp.maximum(ex2 - mean * mean, eps))       # (Bb, C)

    # --- attention TDNN (3C -> A, k=1): split-w1 trick -----------------------
    # mean/std are constant over time, so their conv1 contribution is a
    # per-sequence bias: bias = mean @ w1_mean + std @ w1_std + b1.
    bias = (
        jnp.dot(mean.astype(jnp.bfloat16), w1m_ref[...],
                preferred_element_type=jnp.float32)
        + jnp.dot(std.astype(jnp.bfloat16), w1s_ref[...],
                  preferred_element_type=jnp.float32)
        + b1_ref[...]
    )                                                         # (Bb, A)

    # Big matmul: (Bb*T, C) @ (C, A) in bf16, f32 accumulation. Merging the
    # leading (Bb, T) dims is layout-free when T % 8 == 0.
    x2d = x.reshape(Bb * T, C).astype(jnp.bfloat16)
    h = jnp.dot(x2d, w1x_ref[...], preferred_element_type=jnp.float32)
    h = h.reshape(Bb, T, A) + bias[:, None, :]
    h = jnp.maximum(h, 0.0)                                   # ReLU
    h = h * bn_scale_ref[...][None] + bn_shift_ref[...][None]  # inference BN
    h = jnp.tanh(h).astype(jnp.bfloat16)                      # Tanh

    # --- Conv1d(A -> C, k=1) --------------------------------------------------
    attn = jnp.dot(h.reshape(Bb * T, A), w2_ref[...],
                   preferred_element_type=jnp.float32)
    attn = attn.reshape(Bb, T, C) + b2_ref[...][None]         # (Bb, T, C)

    # --- masked softmax over time --------------------------------------------
    attn = jnp.where(mask > 0.0, attn, -jnp.inf)
    amax = jnp.max(attn, axis=1, keepdims=True)               # (Bb, 1, C)
    e = jnp.exp(attn - amax)
    alpha = e * pl.reciprocal(jnp.sum(e, axis=1, keepdims=True), approx=True)

    # --- attention-weighted statistics (single-pass moments) ------------------
    mu = jnp.sum(alpha * x, axis=1)                           # (Bb, C)
    ex2w = jnp.sum(alpha * x * x, axis=1)                     # (Bb, C)
    sg = jnp.sqrt(jnp.maximum(ex2w - mu * mu, eps))           # (Bb, C)

    # Direct slice stores (no concat copy); lane-aligned when C % 128 == 0.
    out_ref[:, :, pl.ds(0, C)] = mu[:, None, :]
    out_ref[:, :, pl.ds(C, C)] = sg[:, None, :]


def attentive_pool_layer(x_nct, params, lengths=None, *, eps=1e-10, block_b=None):
    """x_nct: (B, C, T) float32 (PyTorch NCT). Returns (B, 2C, 1)."""
    B, C, T = x_nct.shape
    if lengths is None:
        # Matches the PyTorch module's default: torch.ones(B) -> length 1 each.
        lengths = jnp.ones((B,), dtype=jnp.int32)
    lengths3 = lengths.astype(jnp.int32).reshape(B, 1, 1)

    x_btc = jnp.transpose(x_nct, (0, 2, 1)).astype(jnp.float32)   # (B, T, C)

    w1 = params["w1"]                      # (3C, A) f32
    A = w1.shape[1]
    # Split conv1 weight into x / mean / std slices; weights in bf16 for the MXU.
    w1x = w1[:C].astype(jnp.bfloat16)
    w1m = w1[C:2 * C].astype(jnp.bfloat16)
    w1s = w1[2 * C:].astype(jnp.bfloat16)
    w2 = params["w2"].astype(jnp.bfloat16)          # (A, C)
    b1 = params["b1"].astype(jnp.float32)           # (1, A)
    bn_scale = params["bn_scale"].astype(jnp.float32)
    bn_shift = params["bn_shift"].astype(jnp.float32)
    b2 = params["b2"].astype(jnp.float32)           # (1, C)

    if block_b is None:
        # Batch several sequences per grid step (amortize per-step overhead),
        # but keep >= 2 grid steps so both v7x TensorCores get work, and keep
        # the x block a few MiB at most.
        block_b = 1
        max_bb = max(1, B // 2)
        for cand in (8, 4, 2):
            if cand <= max_bb and B % cand == 0 and cand * T * C * 4 <= (4 << 20):
                block_b = cand
                break
    Bb = block_b
    # TODO(synk): for very long T (ECAPA T~1000+ on v7x's 64 MiB VMEM) add a T
    # grid axis with running-moment accumulators instead of whole-T blocks.

    kernel = functools.partial(_attentive_pool_kernel, eps=eps)
    const2 = lambda b: (0, 0)

    out = pl.pallas_call(
        kernel,
        out_shape=jax.ShapeDtypeStruct((B, 1, 2 * C), jnp.float32),
        grid=(B // Bb,),
        in_specs=[
            pl.BlockSpec((Bb, 1, 1), lambda b: (b, 0, 0)),    # lengths
            pl.BlockSpec((Bb, T, C), lambda b: (b, 0, 0)),    # x
            pl.BlockSpec((C, A), const2),                     # w1_x
            pl.BlockSpec((C, A), const2),                     # w1_mean
            pl.BlockSpec((C, A), const2),                     # w1_std
            pl.BlockSpec((1, A), const2),                     # b1
            pl.BlockSpec((1, A), const2),                     # bn_scale
            pl.BlockSpec((1, A), const2),                     # bn_shift
            pl.BlockSpec((A, C), const2),                     # w2
            pl.BlockSpec((1, C), const2),                     # b2
        ],
        out_specs=pl.BlockSpec((Bb, 1, 2 * C), lambda b: (b, 0, 0)),
        compiler_params=pltpu.CompilerParams(
            dimension_semantics=("parallel",),
        ),
    )(lengths3, x_btc, w1x, w1m, w1s, b1, bn_scale, bn_shift, w2, b2)

    return jnp.transpose(out, (0, 2, 1))   # (B, 2C, 1)


def make_params(key, inp_filters, attention_channels, bn_eps=1e-5):
    """Deterministic synthetic parameters (shapes from AttentivePoolLayer.__init__)."""
    k1, k2, k3, k4, k5, k6 = jax.random.split(key, 6)
    C, A = inp_filters, attention_channels
    # Conv1d(3C, A, k=1) weight (A, 3C, 1) -> transposed to (3C, A)
    w1 = 0.1 * jax.random.normal(k1, (3 * C, A), jnp.float32)
    b1 = 0.1 * jax.random.normal(k2, (1, A), jnp.float32)
    # BatchNorm1d(A), inference mode with running_mean=0, running_var=1
    gamma = 1.0 + 0.05 * jax.random.normal(k3, (1, A), jnp.float32)
    beta = 0.05 * jax.random.normal(k4, (1, A), jnp.float32)
    bn_scale = gamma / jnp.sqrt(1.0 + bn_eps)
    bn_shift = beta
    # Conv1d(A, C, k=1) weight (C, A, 1) -> transposed to (A, C)
    w2 = 0.1 * jax.random.normal(k5, (A, C), jnp.float32)
    b2 = 0.1 * jax.random.normal(k6, (1, C), jnp.float32)
    return {"w1": w1, "b1": b1, "bn_scale": bn_scale, "bn_shift": bn_shift,
            "w2": w2, "b2": b2}


def reference(x_nct, params, lengths, eps=1e-10):
    """Pure-JAX f32 reference mirroring the PyTorch forward (inference-mode BN)."""
    B, C, T = x_nct.shape
    x = jnp.transpose(x_nct, (0, 2, 1)).astype(jnp.float32)             # (B,T,C)
    mask = (jnp.arange(T)[None, :] < lengths[:, None]).astype(jnp.float32)
    num = jnp.sum(mask, axis=1, keepdims=True)
    m = (mask / num)[:, :, None]
    mean = jnp.sum(m * x, axis=1)
    std = jnp.sqrt(jnp.maximum(jnp.sum(m * (x - mean[:, None, :]) ** 2, axis=1), eps))
    attn_in = jnp.concatenate(
        [x, jnp.broadcast_to(mean[:, None, :], (B, T, C)),
         jnp.broadcast_to(std[:, None, :], (B, T, C))], axis=2)
    h = attn_in @ params["w1"] + params["b1"]
    h = jnp.maximum(h, 0.0)
    h = h * params["bn_scale"] + params["bn_shift"]
    h = jnp.tanh(h)
    attn = h @ params["w2"] + params["b2"]
    attn = jnp.where(mask[:, :, None] > 0, attn, -jnp.inf)
    alpha = jax.nn.softmax(attn, axis=1)
    mu = jnp.sum(alpha * x, axis=1)
    sg = jnp.sqrt(jnp.maximum(jnp.sum(alpha * (x - mu[:, None, :]) ** 2, axis=1), eps))
    return jnp.concatenate([mu, sg], axis=1)[:, :, None]                 # (B,2C,1)


if __name__ == "__main__":
    B, C, T = 4, 128, 16           # batch, inp_filters, time (lane-aligned C)
    A = 128                        # attention_channels (module default)

    key = jax.random.PRNGKey(0)
    kx, kp = jax.random.split(key)
    x = jax.random.normal(kx, (B, C, T), jnp.float32)   # PyTorch NCT input
    lengths = jnp.array([T, T // 2, T - 4, 5], dtype=jnp.int32)
    params = make_params(kp, C, A)

    out = attentive_pool_layer(x, params, lengths)
    out = jax.block_until_ready(out)

    ref = reference(x, params, lengths)
    assert out.shape == (B, 2 * C, 1), out.shape
    # bf16 MXU matmuls + approx reciprocals => compare against the f32
    # reference with a correspondingly loose tolerance.
    max_err = float(jnp.max(jnp.abs(out - ref)))
    assert max_err < 5e-2, max_err

    print("KERNEL_OK")
</pallas_src>

<mosaic_0001>
module attributes {stable_mosaic.version = 11 : i64} {
  func.func @_attentive_pool_kernel(%arg0: i32, %arg1: memref<2x1x1xi32, #tpu.memory_space<vmem>>, %arg2: memref<2x16x128xf32, #tpu.memory_space<vmem>>, %arg3: memref<128x128xbf16, #tpu.memory_space<vmem>>, %arg4: memref<128x128xbf16, #tpu.memory_space<vmem>>, %arg5: memref<128x128xbf16, #tpu.memory_space<vmem>>, %arg6: memref<1x128xf32, #tpu.memory_space<vmem>>, %arg7: memref<1x128xf32, #tpu.memory_space<vmem>>, %arg8: memref<1x128xf32, #tpu.memory_space<vmem>>, %arg9: memref<128x128xbf16, #tpu.memory_space<vmem>>, %arg10: memref<1x128xf32, #tpu.memory_space<vmem>>, %arg11: memref<2x1x256xf32, #tpu.memory_space<vmem>>) attributes {dimension_semantics = [#tpu.dimension_semantics<parallel>], iteration_bounds = array<i64: 2>, scalar_prefetch = 0 : i64, scratch_operands = 0 : i64, tpu.core_type = #tpu.core_type<tc>, window_params = [{transform_indices = @transform_0, window_bounds = array<i64: 2, 1, 1>}, {transform_indices = @transform_1, window_bounds = array<i64: 2, 16, 128>}, {pipeline_mode = #tpu.pipeline_mode<synchronous>, transform_indices = @transform_2, window_bounds = array<i64: 128, 128>}, {pipeline_mode = #tpu.pipeline_mode<synchronous>, transform_indices = @transform_3, window_bounds = array<i64: 128, 128>}, {pipeline_mode = #tpu.pipeline_mode<synchronous>, transform_indices = @transform_4, window_bounds = array<i64: 128, 128>}, {pipeline_mode = #tpu.pipeline_mode<synchronous>, transform_indices = @transform_5, window_bounds = array<i64: 1, 128>}, {pipeline_mode = #tpu.pipeline_mode<synchronous>, transform_indices = @transform_6, window_bounds = array<i64: 1, 128>}, {pipeline_mode = #tpu.pipeline_mode<synchronous>, transform_indices = @transform_7, window_bounds = array<i64: 1, 128>}, {pipeline_mode = #tpu.pipeline_mode<synchronous>, transform_indices = @transform_8, window_bounds = array<i64: 128, 128>}, {pipeline_mode = #tpu.pipeline_mode<synchronous>, transform_indices = @transform_9, window_bounds = array<i64: 1, 128>}, {transform_indices = @transform_10, window_bounds = array<i64: 2, 1, 256>}]} {
    %c0 = arith.constant 0 : index
    %c0_0 = arith.constant 0 : index
    %c0_1 = arith.constant 0 : index
    %0 = vector.load %arg2[%c0, %c0_0, %c0_1] : memref<2x16x128xf32, #tpu.memory_space<vmem>>, vector<2x16x128xf32>
    %1 = tpu.iota {dimensions = array<i32: 1>} : vector<2x16x1xi32>
    %c0_2 = arith.constant 0 : index
    %c0_3 = arith.constant 0 : index
    %c0_4 = arith.constant 0 : index
    %2 = vector.load %arg1[%c0_2, %c0_3, %c0_4] : memref<2x1x1xi32, #tpu.memory_space<vmem>>, vector<2x1x1xi32>
    %3 = vector.broadcast %2 : vector<2x1x1xi32> to vector<2x16x1xi32>
    %4 = arith.cmpi slt, %1, %3 : vector<2x16x1xi32>
    %5 = arith.extui %4 : vector<2x16x1xi1> to vector<2x16x1xi32>
    %6 = arith.sitofp %5 : vector<2x16x1xi32> to vector<2x16x1xf32>
    %cst = arith.constant dense<0.000000e+00> : vector<2x1xf32>
    %7 = vector.multi_reduction <add>, %6, %cst [1] : vector<2x16x1xf32> to vector<2x1xf32>
    %8 = vector.shape_cast %7 : vector<2x1xf32> to vector<2x1x1xf32>
    %cst_5 = arith.constant 1.000000e+00 : f32
    %9 = vector.broadcast %cst_5 : f32 to vector<2x1x1xf32>
    %10 = arith.maximumf %8, %9 : vector<2x1x1xf32>
    %11 = tpu.reciprocal %10 {approx = true} : vector<2x1x1xf32> -> vector<2x1x1xf32>
    %12 = vector.broadcast %11 : vector<2x1x1xf32> to vector<2x16x1xf32>
    %13 = arith.mulf %6, %12 : vector<2x16x1xf32>
    %14 = vector.broadcast %13 : vector<2x16x1xf32> to vector<2x16x128xf32>
    %15 = arith.mulf %14, %0 : vector<2x16x128xf32>
    %cst_6 = arith.constant dense<0.000000e+00> : vector<2x128xf32>
    %16 = vector.multi_reduction <add>, %15, %cst_6 [1] : vector<2x16x128xf32> to vector<2x128xf32>
    %17 = vector.broadcast %13 : vector<2x16x1xf32> to vector<2x16x128xf32>
    %18 = arith.mulf %17, %0 : vector<2x16x128xf32>
    %19 = arith.mulf %18, %0 : vector<2x16x128xf32>
    %cst_7 = arith.constant dense<0.000000e+00> : vector<2x128xf32>
    %20 = vector.multi_reduction <add>, %19, %cst_7 [1] : vector<2x16x128xf32> to vector<2x128xf32>
    %21 = arith.mulf %16, %16 : vector<2x128xf32>
    %22 = arith.subf %20, %21 : vector<2x128xf32>
    %cst_8 = arith.constant 1.000000e-10 : f32
    %23 = vector.broadcast %cst_8 : f32 to vector<2x128xf32>
    %24 = arith.maximumf %22, %23 : vector<2x128xf32>
    %25 = math.sqrt %24 : vector<2x128xf32>
    %26 = arith.truncf %16 : vector<2x128xf32> to vector<2x128xbf16>
    %c0_9 = arith.constant 0 : index
    %c0_10 = arith.constant 0 : index
    %27 = vector.load %arg4[%c0_9, %c0_10] : memref<128x128xbf16, #tpu.memory_space<vmem>>, vector<128x128xbf16>
    %cst_11 = arith.constant dense<0.000000e+00> : vector<2x128xf32>
    %28 = tpu.matmul %26, %27, %cst_11 {dimension_numbers = #tpu.dot_dimension_numbers<[1], [0], [0], [1], [0, 0, 1, 1], [], []>} : vector<2x128xbf16>, vector<128x128xbf16>, vector<2x128xf32> -> vector<2x128xf32>
    %29 = arith.truncf %25 : vector<2x128xf32> to vector<2x128xbf16>
    %c0_12 = arith.constant 0 : index
    %c0_13 = arith.constant 0 : index
    %30 = vector.load %arg5[%c0_12, %c0_13] : memref<128x128xbf16, #tpu.memory_space<vmem>>, vector<128x128xbf16>
    %cst_14 = arith.constant dense<0.000000e+00> : vector<2x128xf32>
    %31 = tpu.matmul %29, %30, %cst_14 {dimension_numbers = #tpu.dot_dimension_numbers<[1], [0], [0], [1], [0, 0, 1, 1], [], []>} : vector<2x128xbf16>, vector<128x128xbf16>, vector<2x128xf32> -> vector<2x128xf32>
    %32 = arith.addf %28, %31 : vector<2x128xf32>
    %c0_15 = arith.constant 0 : index
    %c0_16 = arith.constant 0 : index
    %33 = vector.load %arg6[%c0_15, %c0_16] : memref<1x128xf32, #tpu.memory_space<vmem>>, vector<1x128xf32>
    %34 = vector.broadcast %33 : vector<1x128xf32> to vector<2x128xf32>
    %35 = arith.addf %32, %34 : vector<2x128xf32>
    %36 = vector.shape_cast %0 : vector<2x16x128xf32> to vector<32x128xf32>
    %37 = arith.truncf %36 : vector<32x128xf32> to vector<32x128xbf16>
    %c0_17 = arith.constant 0 : index
    %c0_18 = arith.constant 0 : index
    %38 = vector.load %arg3[%c0_17, %c0_18] : memref<128x128xbf16, #tpu.memory_space<vmem>>, vector<128x128xbf16>
    %cst_19 = arith.constant dense<0.000000e+00> : vector<32x128xf32>
    %39 = tpu.matmul %37, %38, %cst_19 {dimension_numbers = #tpu.dot_dimension_numbers<[1], [0], [0], [1], [0, 0, 1, 1], [], []>} : vector<32x128xbf16>, vector<128x128xbf16>, vector<32x128xf32> -> vector<32x128xf32>
    %40 = vector.shape_cast %39 : vector<32x128xf32> to vector<2x16x128xf32>
    %41 = vector.shape_cast %35 : vector<2x128xf32> to vector<2x1x128xf32>
    %42 = vector.broadcast %41 : vector<2x1x128xf32> to vector<2x16x128xf32>
    %43 = arith.addf %40, %42 : vector<2x16x128xf32>
    %cst_20 = arith.constant 0.000000e+00 : f32
    %44 = vector.broadcast %cst_20 : f32 to vector<2x16x128xf32>
    %45 = arith.maximumf %43, %44 : vector<2x16x128xf32>
    %c0_21 = arith.constant 0 : index
    %c0_22 = arith.constant 0 : index
    %46 = vector.load %arg7[%c0_21, %c0_22] : memref<1x128xf32, #tpu.memory_space<vmem>>, vector<1x128xf32>
    %47 = vector.shape_cast %46 : vector<1x128xf32> to vector<1x1x128xf32>
    %48 = vector.broadcast %47 : vector<1x1x128xf32> to vector<2x16x128xf32>
    %49 = arith.mulf %45, %48 : vector<2x16x128xf32>
    %c0_23 = arith.constant 0 : index
    %c0_24 = arith.constant 0 : index
    %50 = vector.load %arg8[%c0_23, %c0_24] : memref<1x128xf32, #tpu.memory_space<vmem>>, vector<1x128xf32>
    %51 = vector.shape_cast %50 : vector<1x128xf32> to vector<1x1x128xf32>
    %52 = vector.broadcast %51 : vector<1x1x128xf32> to vector<2x16x128xf32>
    %53 = arith.addf %49, %52 : vector<2x16x128xf32>
    %54 = math.tanh %53 : vector<2x16x128xf32>
    %55 = arith.truncf %54 : vector<2x16x128xf32> to vector<2x16x128xbf16>
    %56 = vector.shape_cast %55 : vector<2x16x128xbf16> to vector<32x128xbf16>
    %c0_25 = arith.constant 0 : index
    %c0_26 = arith.constant 0 : index
    %57 = vector.load %arg9[%c0_25, %c0_26] : memref<128x128xbf16, #tpu.memory_space<vmem>>, vector<128x128xbf16>
    %cst_27 = arith.constant dense<0.000000e+00> : vector<32x128xf32>
    %58 = tpu.matmul %56, %57, %cst_27 {dimension_numbers = #tpu.dot_dimension_numbers<[1], [0], [0], [1], [0, 0, 1, 1], [], []>} : vector<32x128xbf16>, vector<128x128xbf16>, vector<32x128xf32> -> vector<32x128xf32>
    %59 = vector.shape_cast %58 : vector<32x128xf32> to vector<2x16x128xf32>
    %c0_28 = arith.constant 0 : index
    %c0_29 = arith.constant 0 : index
    %60 = vector.load %arg10[%c0_28, %c0_29] : memref<1x128xf32, #tpu.memory_space<vmem>>, vector<1x128xf32>
    %61 = vector.shape_cast %60 : vector<1x128xf32> to vector<1x1x128xf32>
    %62 = vector.broadcast %61 : vector<1x1x128xf32> to vector<2x16x128xf32>
    %63 = arith.addf %59, %62 : vector<2x16x128xf32>
    %cst_30 = arith.constant 0.000000e+00 : f32
    %64 = vector.broadcast %cst_30 : f32 to vector<2x16x1xf32>
    %65 = arith.cmpf ogt, %6, %64 : vector<2x16x1xf32>
    %cst_31 = arith.constant 0xFF800000 : f32
    %66 = vector.shape_cast %65 : vector<2x16x1xi1> to vector<2x16x1xi1>
    %67 = vector.broadcast %66 : vector<2x16x1xi1> to vector<2x16x128xi1>
    %68 = vector.broadcast %cst_31 : f32 to vector<2x16x128xf32>
    %69 = arith.select %67, %63, %68 : vector<2x16x128xi1>, vector<2x16x128xf32>
    %cst_32 = arith.constant dense<0xFF800000> : vector<2x128xf32>
    %70 = vector.multi_reduction <maximumf>, %69, %cst_32 [1] : vector<2x16x128xf32> to vector<2x128xf32>
    %71 = vector.shape_cast %70 : vector<2x128xf32> to vector<2x1x128xf32>
    %72 = vector.broadcast %71 : vector<2x1x128xf32> to vector<2x16x128xf32>
    %73 = arith.subf %69, %72 : vector<2x16x128xf32>
    %74 = math.exp %73 : vector<2x16x128xf32>
    %cst_33 = arith.constant dense<0.000000e+00> : vector<2x128xf32>
    %75 = vector.multi_reduction <add>, %74, %cst_33 [1] : vector<2x16x128xf32> to vector<2x128xf32>
    %76 = vector.shape_cast %75 : vector<2x128xf32> to vector<2x1x128xf32>
    %77 = tpu.reciprocal %76 {approx = true} : vector<2x1x128xf32> -> vector<2x1x128xf32>
    %78 = vector.broadcast %77 : vector<2x1x128xf32> to vector<2x16x128xf32>
    %79 = arith.mulf %74, %78 : vector<2x16x128xf32>
    %80 = arith.mulf %79, %0 : vector<2x16x128xf32>
    %cst_34 = arith.constant dense<0.000000e+00> : vector<2x128xf32>
    %81 = vector.multi_reduction <add>, %80, %cst_34 [1] : vector<2x16x128xf32> to vector<2x128xf32>
    %82 = arith.mulf %79, %0 : vector<2x16x128xf32>
    %83 = arith.mulf %82, %0 : vector<2x16x128xf32>
    %cst_35 = arith.constant dense<0.000000e+00> : vector<2x128xf32>
    %84 = vector.multi_reduction <add>, %83, %cst_35 [1] : vector<2x16x128xf32> to vector<2x128xf32>
    %85 = arith.mulf %81, %81 : vector<2x128xf32>
    %86 = arith.subf %84, %85 : vector<2x128xf32>
    %cst_36 = arith.constant 1.000000e-10 : f32
    %87 = vector.broadcast %cst_36 : f32 to vector<2x128xf32>
    %88 = arith.maximumf %86, %87 : vector<2x128xf32>
    %89 = math.sqrt %88 : vector<2x128xf32>
    %90 = vector.shape_cast %81 : vector<2x128xf32> to vector<2x1x128xf32>
    %c0_37 = arith.constant 0 : index
    %c0_38 = arith.constant 0 : index
    %c0_39 = arith.constant 0 : index
    %91 = vector.load %arg11[%c0_37, %c0_38, %c0_39] : memref<2x1x256xf32, #tpu.memory_space<vmem>>, vector<2x1x128xf32>
    tpu.vector_store %arg11[%c0_37, %c0_38, %c0_39], %90 {strides = array<i32>} : memref<2x1x256xf32, #tpu.memory_space<vmem>>, vector<2x1x128xf32>,
    %92 = vector.shape_cast %89 : vector<2x128xf32> to vector<2x1x128xf32>
    %c0_40 = arith.constant 0 : index
    %c0_41 = arith.constant 0 : index
    %c128 = arith.constant 128 : index
    %93 = vector.load %arg11[%c0_40, %c0_41, %c128] : memref<2x1x256xf32, #tpu.memory_space<vmem>>, vector<2x1x128xf32>
    tpu.vector_store %arg11[%c0_40, %c0_41, %c128], %92 {strides = array<i32>} : memref<2x1x256xf32, #tpu.memory_space<vmem>>, vector<2x1x128xf32>,
    return
  }
  func.func @transform_0(%arg0: i32) -> (i32, i32, i32) {
    %c0_i32 = arith.constant 0 : i32
    %c0_i32_0 = arith.constant 0 : i32
    %c0_i32_1 = arith.constant 0 : i32
    return %arg0, %c0_i32, %c0_i32_0 : i32, i32, i32
  }
  func.func @transform_1(%arg0: i32) -> (i32, i32, i32) {
    %c0_i32 = arith.constant 0 : i32
    %c0_i32_0 = arith.constant 0 : i32
    %c0_i32_1 = arith.constant 0 : i32
    return %arg0, %c0_i32, %c0_i32_0 : i32, i32, i32
  }
  func.func @transform_2(%arg0: i32) -> (i32, i32) {
    %c0_i32 = arith.constant 0 : i32
    %c0_i32_0 = arith.constant 0 : i32
    %c0_i32_1 = arith.constant 0 : i32
    return %c0_i32, %c0_i32_0 : i32, i32
  }
  func.func @transform_3(%arg0: i32) -> (i32, i32) {
    %c0_i32 = arith.constant 0 : i32
    %c0_i32_0 = arith.constant 0 : i32
    %c0_i32_1 = arith.constant 0 : i32
    return %c0_i32, %c0_i32_0 : i32, i32
  }
  func.func @transform_4(%arg0: i32) -> (i32, i32) {
    %c0_i32 = arith.constant 0 : i32
    %c0_i32_0 = arith.constant 0 : i32
    %c0_i32_1 = arith.constant 0 : i32
    return %c0_i32, %c0_i32_0 : i32, i32
  }
  func.func @transform_5(%arg0: i32) -> (i32, i32) {
    %c0_i32 = arith.constant 0 : i32
    %c0_i32_0 = arith.constant 0 : i32
    %c0_i32_1 = arith.constant 0 : i32
    return %c0_i32, %c0_i32_0 : i32, i32
  }
  func.func @transform_6(%arg0: i32) -> (i32, i32) {
    %c0_i32 = arith.constant 0 : i32
    %c0_i32_0 = arith.constant 0 : i32
    %c0_i32_1 = arith.constant 0 : i32
    return %c0_i32, %c0_i32_0 : i32, i32
  }
  func.func @transform_7(%arg0: i32) -> (i32, i32) {
    %c0_i32 = arith.constant 0 : i32
    %c0_i32_0 = arith.constant 0 : i32
    %c0_i32_1 = arith.constant 0 : i32
    return %c0_i32, %c0_i32_0 : i32, i32
  }
  func.func @transform_8(%arg0: i32) -> (i32, i32) {
    %c0_i32 = arith.constant 0 : i32
    %c0_i32_0 = arith.constant 0 : i32
    %c0_i32_1 = arith.constant 0 : i32
    return %c0_i32, %c0_i32_0 : i32, i32
  }
  func.func @transform_9(%arg0: i32) -> (i32, i32) {
    %c0_i32 = arith.constant 0 : i32
    %c0_i32_0 = arith.constant 0 : i32
    %c0_i32_1 = arith.constant 0 : i32
    return %c0_i32, %c0_i32_0 : i32, i32
  }
  func.func @transform_10(%arg0: i32) -> (i32, i32, i32) {
    %c0_i32 = arith.constant 0 : i32
    %c0_i32_0 = arith.constant 0 : i32
    %c0_i32_1 = arith.constant 0 : i32
    return %arg0, %c0_i32, %c0_i32_0 : i32, i32, i32
  }
}

</mosaic_0001>

<bundles_post_ra>
// kernel: tpu_custom_call.1
= control target key start
LH: loop header
LB: loop body
LE: loop exit
PB: predicated region body
PF: predicated region fallthrough
CT: control target
= control target key end

     0   :  { %s2369_s0 = inlined_call_operand.vmem [shape: s32[4,1,1], index: 0, kind: input, shape index: {}]   ;;  %s2370_s1 = inlined_call_operand.hbm [shape: f32[4,16,128], index: 1, kind: input, shape index: {}]   ;;  %s2371_s2 = inlined_call_operand.hbm [shape: bf16[128,128], index: 2, kind: input, shape index: {}]   ;;  %s2372_s3 = inlined_call_operand.hbm [shape: bf16[128,128], index: 3, kind: input, shape index: {}]   ;;  %s2373_s4 = inlined_call_operand.hbm [shape: bf16[128,128], index: 4, kind: input, shape index: {}]   ;;  %s2374_s5 = inlined_call_operand.vmem [shape: f32[1,128], index: 5, kind: input, shape index: {}]   ;;  %s2375_s6 = inlined_call_operand.vmem [shape: f32[1,128], index: 6, kind: input, shape index: {}]   ;;  %s2376_s7 = inlined_call_operand.vmem [shape: f32[1,128], index: 7, kind: input, shape index: {}]   ;;  %s2377_s8 = inlined_call_operand.hbm [shape: bf16[128,128], index: 8, kind: input, shape index: {}]   ;;  %s2378_s9 = inlined_call_operand.vmem [shape: f32[1,128], index: 9, kind: input, shape index: {}]   ;;  %s2379_s10 = inlined_call_operand.hbm [shape: f32[4,1,256], index: 10, kind: output, shape index: {}]  }
   0x1   :  { %2384 = sst [smem:[#allocation16_spill]] %s2371_s2 }
   0x2   :  { %2385 = sst [smem:[#allocation17_spill]] %s2372_s3 }
   0x3   :  { %2386 = sst [smem:[#allocation18_spill]] %s2373_s4 }
   0x4   :  { %2387 = sst [smem:[#allocation19_spill]] %s2377_s8 }
   0x5   :  { %15 = vsyncpa [#allocation3], 0 }
   0x6   :  { %17 = vsyncpa [#allocation3 + $0x1], 0 }
   0x7   :  { %18 = vsyncpa [#allocation6], 0 }
   0x8   :  { %19 = vsyncpa [#allocation9], 0 }
   0x9   :  { %20 = vsyncpa [#allocation4], 0 }
   0xa   :  { %22 = vsyncpa [#allocation4 + $0x1], 0  ;;  %s2036_s13 = smov 0   ;;  %s2038_s14 = smov 0  }
   0xb   :  { %s2040_s15 = smov 0   ;;  %s2042_s16 = smov 0  }
   0xc LB: > { %s2057_s17 = sadd.s32 4294967295, %s1963_s16   ;;  %s1407_s18 = sadd.s32 4294967294, %s1963_s16   ;;  %s1963_s16 = sphi %s2042_s16, %s2412_s16   ;;  %s1959_s15 = sphi %s2040_s15, %s2411_s15   ;;  %s1955_s14 = sphi %s2038_s14, %s2410_s14   ;;  %s1951_s13 = sphi %s2036_s13, %s2409_s13  }
   0xd   : > { %p74_p0 = scmp.ne.s32.totalorder %s1955_s14, %s1951_s13  ;;  %p2380_p1 = scmp.eq.s32.totalorder %s2057_s17, 0 }
   0xe   : > { %p266_p2 = scmp.eq.s32.totalorder %s2057_s17, 1  ;;  %p272_p3 = scmp.eq.s32.totalorder %s1407_s18, 1 }
   0xf   : > { %p2066_p4 = por %p2380_p1, %p74_p0  ;;  %p1408_p5 = scmp.ge.s32.totalorder %s1963_s16, 1 }
  0x10   : > { %p2071_p6 = por %p272_p3, %p74_p0  ;;  %p279_p7 = scmp.lt.s32.totalorder %s1963_s16, 3 }
  0x11   : > { %s2388_s19 = scalar_select %p2066_p4, 1, 0 }
  0x12   : > { %s2389_s20 = scalar_select %p2071_p6, 1, 0 }
  0x13   : > { %p2076_p8 = pnand %p1408_p5, %p279_p7  ;;  %s1965_s22 = smov [#allocation5]  }
  0x14   : > { %s291_s23 = sshll.u32 %s1965_s22, 4  ;;  %s1966_s25 = smov [#allocation8]   ;;  %s292_s23 = int_to_ptr.vmem [resolvable:$true] %s291_s23 }
  0x15   : > { %s2390_s21 = scalar_select %p2076_p8, 1, 0 }
  0x16   : > { %p1616_p9 = pneg %p2076_p8  ;;  %s317_s26 = sshll.u32 %s1966_s25, 4  ;;  %s318_s26 = int_to_ptr.vmem [resolvable:$true] %s317_s26 }
  0x17   : > { %s1967_s27 = smov [#allocation7]   ;;  %s1770_s29 = scalar_lea.vmem %s292_s23, 1024 }
  0x18   : > { %p2085_p11 = pnand %p1616_p9, %p2380_p1  ;;  %s304_s28 = sshll.u32 %s1967_s27, 4  ;;  %s305_s28 = int_to_ptr.vmem [resolvable:$true] %s304_s28 }
  0x19   : > { %p1771_p13 = scmp.ne.s32.totalorder %s292_s23, %s1770_s29  ;;  %p1778_p5 = scmp.lt.s32.totalorder %s292_s23, %s292_s23 }
  0x1a   : > { %p1761_p12 = pneg %p2085_p11  ;;  %p1779_p7 = scmp.lt.s32.totalorder %s1770_s29, %s1770_s29 }
  0x1c   : > { %p1773_p0 = pnand %p1771_p13, %p1761_p12  ;;  %p1780_p9 = por %p1779_p7, %p1778_p5 }
  0x1e   : > { %p1774_p3 = pneg %p1773_p0 }
  0x20   : > { %p1781_p10 = pnand %p1780_p9, %p1774_p3 }
  0x22   : > { %1784 = shalt.err (!%p1781_p10)
}
  0x23   : > { %s1968_s30 = smov 64   ;;  %s1969_s11 = smov 4  }
  0x24   : > { %s2392_s2 = sld [smem:[#allocation16_spill]]  ;;  %s1796_s22 = scalar_lea.vmem %s318_s26, 1024 }
  0x25   : > { %p1797_p13 = scmp.ne.s32.totalorder %s318_s26, %s1796_s22  ;;  %p1804_p3 = scmp.lt.s32.totalorder %s318_s26, %s318_s26 }
  0x26   : > { %p1805_p10 = scmp.lt.s32.totalorder %s1796_s22, %s1796_s22 }
  0x27   : > { %p1799_p0 = pnand %p1797_p13, %p1761_p12 }
  0x28   : > { %p1806_p7 = por %p1805_p10, %p1804_p3 }
  0x29   : > { %p1800_p5 = pneg %p1799_p0 }
  0x2a   : > { %1619 = dma.hbm_to_vmem [thread:$0]  (!%p2085_p11), %s2392_s2, 1024, %s292_s23, [#allocation6], %s1968_s30, %s1968_s30, %s1969_s11  }
  0x2b   : > { %p1807_p9 = pnand %p1806_p7, %p1800_p5 }
  0x2d   : > { %1810 = shalt.err (!%p1807_p9)
}
  0x2e   : > { %s2393_s4 = sld [smem:[#allocation18_spill]]  ;;  %s1822_s23 = scalar_lea.vmem %s305_s28, 1024 }
  0x2f   : > { %p1823_p1 = scmp.ne.s32.totalorder %s305_s28, %s1822_s23  ;;  %p1830_p3 = scmp.lt.s32.totalorder %s305_s28, %s305_s28 }
  0x30   : > { %p1831_p5 = scmp.lt.s32.totalorder %s1822_s23, %s1822_s23 }
  0x31   : > { %p1825_p13 = pnand %p1823_p1, %p1761_p12 }
  0x32   : > { %p1832_p10 = por %p1831_p5, %p1830_p3 }
  0x33   : > { %p1826_p0 = pneg %p1825_p13 }
  0x34   : > { %1625 = dma.hbm_to_vmem [thread:$0]  (!%p2085_p11), %s2393_s4, 1024, %s318_s26, [#allocation9], %s1968_s30, %s1968_s30, %s1969_s11  }
  0x35   : > { %p1833_p7 = pnand %p1832_p10, %p1826_p0 }
  0x37   : > { %1836 = shalt.err (!%p1833_p7)
}
  0x38   : > { %s2394_s3 = sld [smem:[#allocation17_spill]]  ;;  %s1970_s26 = smov [#allocation10]  }
  0x39   : > { %s339_s18 = sshll.u32 %s1970_s26, 4  ;;  %s340_s18 = int_to_ptr.vmem [resolvable:$true] %s339_s18 }
  0x3a   : > { %s1848_s22 = scalar_lea.vmem %s340_s18, 1024  ;;  %p1856_p0 = scmp.lt.s32.totalorder %s340_s18, %s340_s18 }
  0x3b   : > { %p1849_p1 = scmp.ne.s32.totalorder %s340_s18, %s1848_s22  ;;  %p1857_p3 = scmp.lt.s32.totalorder %s1848_s22, %s1848_s22 }
  0x3d   : > { %p1851_p9 = pnand %p1849_p1, %p1761_p12  ;;  %p1858_p5 = por %p1857_p3, %p1856_p0 }
  0x3e   : > { %1622 = dma.hbm_to_vmem [thread:$0]  (!%p2085_p11), %s2394_s3, 1024, %s305_s28, [#allocation6], %s1968_s30, %s1968_s30, %s1969_s11  }
  0x3f   : > { %p1852_p13 = pneg %p1851_p9 }
  0x41   : > { %p1859_p10 = pnand %p1858_p5, %p1852_p13 }
  0x43   : > { %1862 = shalt.err (!%p1859_p10)
}
  0x44   : > { %s2395_s8 = sld [smem:[#allocation19_spill]]  ;;  %s2136_s27 = sadd.s32 1, %s1963_s16  }
  0x45   : > { %s61_s24 = sadd.s32 1, %s1959_s15  ;;  %s58_s23 = ssub.s32 %s1963_s16, %s2136_s27 }
  0x46   : > { %p68_p12 = scmp.ne.s32.totalorder %s1959_s15, %s1955_s14  ;;  %p59_p7 = scmp.eq.s32.totalorder %s58_s23, 0 }
  0x47   : > { %p69_p1 = scmp.eq.s32.totalorder %s1963_s16, 0  ;;  %p1641_p13 = scmp.lt.s32.totalorder %s1963_s16, 2 }
  0x48   : > { %p2146_p9 = por %p266_p2, %p68_p12  ;;  %s364_s26 = sand.u32 1, %s1959_s15  }
  0x49   : > { %s2152_s12 = scalar_select %p59_p7, %s1959_s15, %s61_s24  }
  0x4a   : > { %1628 = dma.hbm_to_vmem [thread:$0]  (!%p2085_p11), %s2395_s8, 1024, %s340_s18, [#allocation9], %s1968_s30, %s1968_s30, %s1969_s11  }
  0x4b   : > { %s2396_s29 = scalar_select %p2146_p9, 1, 0 }
  0x4c   : > { %p70_p0 = por %p69_p1, %p68_p12  ;;  %s1414_s22 = sshll.u32 %s364_s26, 5 }
  0x4d   : > { %s1475_s30 = sshll.u32 %s1963_s16, 9  ;;  %s368_s25 = scalar_lea.vmem [#allocation2], %s1414_s22 }
  0x4e   : > { %s2159_s28 = scalar_lea.hbm %s2370_s1, %s1475_s30  ;;  %s376_s23 = sshll.u32 %s368_s25, 4  ;;  %s2161_s23 = int_to_ptr.vmem [resolvable:$true] %s376_s23 }
  0x4f   : > { %p2163_p2 = pnand %p1641_p13, %p70_p0  ;;  %s2167_s24 = scalar_lea.sflag [#allocation3], %s364_s26 }
  0x50   : > { %s1863_s3 = scalar_lea.hbm %s2159_s28, 512  ;;  %s1868_s22 = scalar_lea.hbm %s2370_s1, 1024 }
  0x51   : > { %p1864_p11 = scmp.ne.s32.totalorder %s2159_s28, %s1863_s3  ;;  %p1865_p3 = pneg %p2163_p2 }
  0x52   : > { %p1869_p12 = scmp.lt.s32.totalorder %s2159_s28, %s2370_s1  ;;  %p1870_p7 = scmp.lt.s32.totalorder %s1868_s22, %s1863_s3 }
  0x53   : > { %p1866_p5 = pnand %p1865_p3, %p1864_p11 }
  0x54   : > { %p1871_p1 = por %p1870_p7, %p1869_p12 }
  0x55   : > { %p1867_p10 = pneg %p1866_p5 }
  0x57   : > { %p1872_p13 = pnand %p1871_p1, %p1867_p10 }
  0x59   : > { %1875 = shalt.err (!%p1872_p13)
}
  0x5a   : > { %s1876_s26 = scalar_lea.vmem %s2161_s23, 512  ;;  %s1971_s4 = smov [#allocation2]  }
  0x5b   : > { %p1877_p0 = scmp.ne.s32.totalorder %s2161_s23, %s1876_s26  ;;  %s1881_s8 = sshll.u32 %s1971_s4, 4  ;;  %s1882_s8 = int_to_ptr.vmem [resolvable:$false] %s1881_s8 }
  0x5c   : > { %s1883_s30 = scalar_lea.vmem %s1882_s8, 1024  ;;  %p1884_p5 = scmp.lt.s32.totalorder %s2161_s23, %s1882_s8 }
  0x5d   : > { %p1879_p6 = pnand %p1877_p0, %p1865_p3  ;;  %p1885_p9 = scmp.lt.s32.totalorder %s1883_s30, %s1876_s26 }
  0x5f   : > { %p1880_p11 = pneg %p1879_p6  ;;  %p1886_p4 = por %p1885_p9, %p1884_p5 }
  0x61   : > { %p1887_p8 = pnand %p1886_p4, %p1880_p11 }
  0x63   : > { %1890 = shalt.err (!%p1887_p8)
}
  0x64   : > { %s1972_s3 = smov 128   ;;  %s1973_s11 = smov 8  }
  0x65   : > { %1632 = dma.hbm_to_vmem [thread:$0]  (!%p2163_p2), %s2159_s28, 512, %s2161_s23, %s2167_s24, %s1972_s3, %s1972_s3, %s1973_s11  }
  0x66   : > { %p2398_p3 = scmp.ne.s32.totalorder %s2390_s21, 0 }
  0x67   : > { %s2191_s4 = sand.u32 (!%p2398_p3), 1, %s1955_s14   ;;  %p2399_p4 = scmp.ne.s32.totalorder (!%p2398_p3), %s2388_s19, 0 }
  0x68   : > { %388 = sbr.rel (%p2398_p3) target bundleno = 909 (0x38d), region = 60  ;;  %s1419_s8 = sshll.u32 (!%p2398_p3), %s2191_s4, 5 }
  0x69   : > { %s391_s22 = scalar_lea.sflag (!%p2398_p3), [#allocation3], %s2191_s4  ;;  %s2195_s18 = scalar_lea.vmem (!%p2398_p3), [#allocation2], %s1419_s8 }
  0x6d   : > { %1934 = dma.done.wait (%p2399_p4), %s391_s22, 512  }
  0x6e   : > { %1936 = vsyncadd (%p2399_p4), %s391_s22, 4294966784  ;;  %p2400_p6 = scmp.eq.s32.totalorder %s2057_s17, 0 }
  0x70   : > { %1938 = dma.done.wait (%p2400_p6), [#allocation6], 2048   ;;  %p2401_p8 = pmov %p2400_p6 }
  0x71   : > { %p2402_p9 = pmov %p2400_p6 }
  0x72   : > { %1940 = vsyncadd (%p2401_p8), [#allocation6], 4294965248 }
  0x73   : > { %1942 = dma.done.wait (%p2402_p9), [#allocation9], 2048   ;;  %p2403_p2 = pmov %p2400_p6 }
  0x74   : > { %s1425_s2 = sshll.u32 %s2057_s17, 1  ;;  %v463_v0 = vlaneseq  ;;  %v1974_v1 = vmov 0   ;;  %v1975_v3 = vmov 0.0   ;;  %vm488_vm0 = vcmask 7168   ;;  %v1695_v7 = vld [vmem:[#allocation7 + $0x38] sm:$0xff]   ;;  %v1696_v32 = vld [vmem:[#allocation7 + $0x30] sm:$0xff]  }
  0x75   : > { %1944 = vsyncadd (%p2403_p2), [#allocation9], 4294965248  ;;  %1694 = vset.pattern.permute.xlu1 %v1974_v1  ;;  %1693 = vset.pattern.permute.xlu0 %v1974_v1  ;;  %p452_p10 = scmp.lt.s32.totalorder %s1425_s2, 3  ;;  %v1697_v37 = vld [vmem:[#allocation7 + $0x28] sm:$0xff]   ;;  %v1698_v40 = vld [vmem:[#allocation7 + $0x20] sm:$0xff]   ;;  %vm1976_vm9 = vmmov 0  }
  0x76   : > { %v2213_v2 = vshrl.u32 %v463_v0, 7  ;;  %1536 = vmatprep.subr.bf16.mxu1 %v1975_v3  ;;  %1516 = vmatprep.subr.bf16.mxu0 %v1975_v3  ;;  %v1699_v43 = vld [vmem:[#allocation7 + $0x18] sm:$0xff]   ;;  %v1700_v46 = vld [vmem:[#allocation7 + $0x10] sm:$0xff]   ;;  %v1702_v48 = vld [vmem:[#allocation7 + $0x8] sm:$0xff]   ;;  %vm631_vm10 = vcmask 1041409   ;;  %s1424_s22 = sshll.u32 %s2191_s4, 2 }
  0x77   : > { %s2414_s2 = smov (!%p452_p10, %s1425_s2), 3  ;;  %1537 = vmatpush3.bf16.msra.mxu1 %v1695_v7  ;;  %v1701_v47 = vld [vmem:[#allocation8 + $0x38] sm:$0xff]   ;;  %v1703_v49 = vld [vmem:[#allocation8 + $0x30] sm:$0xff]   ;;  %v1704_v50 = vld [vmem:[#allocation7] sm:$0xff]   ;;  %1552 = vmatprep.mubr.msk.bf16.mxu1 %vm1976_vm9, %v1975_v3  ;;  %p2406_p7 = scmp.ne.s32.totalorder %s2396_s29, 0 }
  0x78   : > { %v465_v4 = vadd.s32 8, %v2213_v2  ;;  %s454_s28 = scalar_lea.vmem %s2369_s0, %s2414_s2  ;;  %1538 = vmatprep.subr.bf16.mxu1 %v1975_v3  ;;  %1517 = vmatpush3.bf16.msra.mxu0 %v1701_v47  ;;  %v1705_v51 = vld [vmem:[#allocation8 + $0x28] sm:$0xff]   ;;  %v1706_v52 = vld [vmem:[#allocation8 + $0x20] sm:$0xff]   ;;  %v1707_v53 = vld [vmem:[#allocation8 + $0x18] sm:$0xff]   ;;  %s1477_s2 = sshll.u32 %s2057_s17, 6 }
  0x79   : > { %v1427_v5 = vld [vmem:[%s454_s28 + $0x1] ss:$0 sm:$0xff]  ;;  %v1426_v6 = vld [vmem:[%s454_s28] ss:$0 sm:$0xff]  ;;  %1518 = vmatprep.subr.bf16.mxu0 %v1975_v3  ;;  %1532 = vmatprep.mubr.msk.bf16.mxu0 %vm1976_vm9, %v1975_v3  ;;  %v1708_v54 = vld [vmem:[#allocation8 + $0x10] sm:$0xff]   ;;  %s2321_s23 = scalar_lea.hbm %s2379_s10, %s1477_s2  ;;  %s1273_s17 = scalar_lea.sflag [#allocation4], %s2191_s4 }
  0x7a   : > { %vm478_vm1 = vcmp.lt.s32.totalorder %v2213_v2, %v1427_v5  ;;  %vm479_vm2 = vcmp.lt.s32.totalorder %v465_v4, %v1427_v5  ;;  %vm476_vm3 = vcmp.lt.s32.totalorder %v2213_v2, %v1426_v6  ;;  %vm477_vm4 = vcmp.lt.s32.totalorder %v465_v4, %v1426_v6  ;;  %v1709_v55 = vld [vmem:[#allocation8 + $0x8] sm:$0xff]   ;;  %v1710_v56 = vld [vmem:[#allocation8] sm:$0xff]   ;;  %v2247_v57 = vld [vmem:[#allocation5 + $0x38] sm:$0xff]   ;;  %s1978_s25 = smov [#allocation11]  }
  0x7b   : > { %v1430_v8 = vsel %vm478_vm1, 1.0, %v1975_v3  ;;  %v1431_v9 = vsel %vm479_vm2, 1.0, %v1975_v3  ;;  %v1428_v10 = vsel %vm476_vm3, 1.0, %v1975_v3  ;;  %v1429_v11 = vsel %vm477_vm4, 1.0, %v1975_v3  ;;  %1539 = vmatpush3.bf16.msra.mxu1 %v1696_v32  ;;  %v2251_v59 = vld [vmem:[%s2195_s18 + $0x10] sm:$0xff]  ;;  %v2254_v61 = vld [vmem:[%s2195_s18] sm:$0xff] }
  0x7c   : > { %v498_v12 = vsel %vm488_vm0, %v1430_v8, 0.0  ;;  %v499_v13 = vsel %vm488_vm0, %v1431_v9, 0.0  ;;  %v489_v14 = vsel %vm488_vm0, %v1428_v10, 0.0  ;;  %v490_v15 = vsel %vm488_vm0, %v1429_v11, 0.0  ;;  %1540 = vmatprep.subr.bf16.mxu1 %v1975_v3  ;;  %1519 = vmatpush3.bf16.msra.mxu0 %v1703_v49  ;;  %v2257_v62 = vld [vmem:[%s2195_s18 + $0x18] sm:$0xff]  ;;  %s1895_s26 = sshll.u32 %s1978_s25, 4  ;;  %s1896_s26 = int_to_ptr.vmem [resolvable:$false] %s1895_s26 }
  0x7d   : > { %v500_v16 = vadd.f32 %v499_v13, %v498_v12  ;;  %v491_v17 = vadd.f32 %v490_v15, %v489_v14  ;;  %vm1135_vm5 = vcmp.gt.f32.partialorder %v1429_v11, 0.0  ;;  %vm1134_vm6 = vcmp.gt.f32.partialorder %v1428_v10, 0.0  ;;  %1520 = vmatprep.subr.bf16.mxu0 %v1975_v3  ;;  %s1897_s30 = scalar_lea.vmem %s1896_s26, 128 }
  0x7e   : > { %v1139_v41 = vsel %vm1135_vm5, 1, %v1974_v1  ;;  %v1138_v42 = vsel %vm1134_vm6, 1, %v1974_v1  ;;  %vm1137_vm7 = vcmp.gt.f32.partialorder %v1431_v9, 0.0  ;;  %vm1136_vm8 = vcmp.gt.f32.partialorder %v1430_v8, 0.0 }
  0x7f   : > { %v501_v18 = vrot.slane %v500_v16, 4  ;;  %v492_v19 = vrot.slane %v491_v17, 4  ;;  %1541 = vmatpush3.bf16.msra.mxu1 %v1697_v37  ;;  %v1141_v44 = vsel %vm1137_vm7, 1, %v1974_v1  ;;  %v1140_v45 = vsel %vm1136_vm8, 1, %v1974_v1  ;;  %v2261_v1 = vld [vmem:[%s2195_s18 + $0x8] sm:$0xff]  ;;  %s2305_s18 = scalar_lea.vmem [#allocation11], %s1424_s22 }
  0x80   : > { %1542 = vmatprep.subr.bf16.mxu1 %v1975_v3  ;;  %1521 = vmatpush3.bf16.msra.mxu0 %v1705_v51  ;;  %vm2301_vm3 = vcmp.lt.s32.totalorder %v463_v0, 128  ;;  %s1287_s19 = sshll.u32 %s2305_s18, 4  ;;  %s2323_s19 = int_to_ptr.vmem [resolvable:$true] %s1287_s19 }
  0x81   : > { %v502_v20 = vadd.f32 %v501_v18, %v500_v16  ;;  %v493_v21 = vadd.f32 %v492_v19, %v491_v17  ;;  %1522 = vmatprep.subr.bf16.mxu0 %v1975_v3  ;;  %s1891_s24 = scalar_lea.vmem %s2323_s19, 64  ;;  %p1898_p0 = scmp.lt.s32.totalorder %s2323_s19, %s1896_s26 }
  0x82   : > { %p1892_p12 = scmp.ne.s32.totalorder %s2323_s19, %s1891_s24  ;;  %p1899_p11 = scmp.lt.s32.totalorder %s1897_s30, %s1891_s24 }
  0x83   : > { %v503_v22 = vrot.slane %v502_v20, 2  ;;  %v494_v23 = vrot.slane %v493_v21, 2  ;;  %1543 = vmatpush3.bf16.msra.mxu1 %v1698_v40 }
  0x84   : > { %1544 = vmatprep.subr.bf16.mxu1 %v1975_v3  ;;  %1523 = vmatpush3.bf16.msra.mxu0 %v1706_v52  ;;  %p1893_p1 = pnand %p1892_p12, %p2406_p7  ;;  %p1900_p5 = por %p1899_p11, %p1898_p0 }
  0x85   : > { %v504_v24 = vadd.f32 %v503_v22, %v502_v20  ;;  %v495_v25 = vadd.f32 %v494_v23, %v493_v21  ;;  %1524 = vmatprep.subr.bf16.mxu0 %v1975_v3 }
  0x86   : > { %p1894_p13 = pneg %p1893_p1 }
  0x87   : > { %v505_v26 = vrot.slane %v504_v24, 1  ;;  %v496_v27 = vrot.slane %v495_v25, 1  ;;  %1545 = vmatpush3.bf16.msra.mxu1 %v1699_v43 }
  0x88   : > { %1546 = vmatprep.subr.bf16.mxu1 %v1975_v3  ;;  %1525 = vmatpush3.bf16.msra.mxu0 %v1707_v53  ;;  %p1901_p3 = pnand %p1900_p5, %p1894_p13 }
  0x89   : > { %v506_v28 = vadd.f32 %v505_v26, %v504_v24  ;;  %v497_v29 = vadd.f32 %v496_v27, %v495_v25  ;;  %1526 = vmatprep.subr.bf16.mxu0 %v1975_v3 }
  0x8b   : > { %v508_v30 = vmax.f32 %v506_v28, 1.0  ;;  %v507_v31 = vmax.f32 %v497_v29, 1.0  ;;  %1547 = vmatpush3.bf16.msra.mxu1 %v1700_v46 }
  0x8c   : > { %1548 = vmatprep.subr.bf16.mxu1 %v1975_v3  ;;  %1527 = vmatpush3.bf16.msra.mxu0 %v1708_v54 }
  0x8d   : > { %1727 = vrcp.f32 %v508_v30  ;;  %1528 = vmatprep.subr.bf16.mxu0 %v1975_v3 }
  0x8e   : > { %1729 = vrcp.f32 %v507_v31 }
  0x8f   : > { %1549 = vmatpush3.bf16.msra.mxu1 %v1702_v48 }
  0x90   : > { %1550 = vmatprep.subr.bf16.mxu1 %v1975_v3  ;;  %1529 = vmatpush3.bf16.msra.mxu0 %v1709_v55 }
  0x91   : > { %1530 = vmatprep.subr.bf16.mxu0 %v1975_v3 }
  0x93   : > { %1551 = vmatpush3.bf16.msra.mxu1 %v1704_v50 }
  0x94   : > { %1531 = vmatpush3.bf16.msra.mxu0 %v1710_v56 }
  0x95   : > { %1556 = vmatprep.subr.bf16.mxu0 %v2247_v57 }
  0x9a   : > { %v1728_v33 = vpop.eup %1727 }
  0x9b   : > { %v1730_v34 = vpop.eup %1729  ;;  %v513_v35 = vmul.f32 %v1728_v33, %v1430_v8  ;;  %v514_v38 = vmul.f32 %v1728_v33, %v1431_v9 }
  0x9c   : > { %v511_v36 = vmul.f32 %v1730_v34, %v1428_v10  ;;  %v512_v39 = vmul.f32 %v1730_v34, %v1429_v11 }
  0x9d   : > { %527 = vperm.xlu1 %1694, %v513_v35  }
  0x9e   : > { %517 = vperm.xlu0 %1693, %v511_v36  }
  0xa1   : > { %532 = vperm.xlu1 %1694, %v514_v38  }
  0xa2   : > { %522 = vperm.xlu0 %1693, %v512_v39  }
  0xa5   : > { %1146 = vperm.xlu1 %1694, %v1139_v41  }
  0xa6   : > { %1143 = vperm.xlu0 %1693, %v1138_v42  }
  0xa9   : > { %1152 = vperm.xlu1 %1694, %v1141_v44  }
  0xaa   : > { %1149 = vperm.xlu0 %1693, %v1140_v45  }
 0x118   : > { %v528_v58 = vpop.permute.xlu1 %527 }
 0x119   : > { %v518_v60 = vpop.permute.xlu0 %517  ;;  %v537_v63 = vmul.f32 %v528_v58, %v2251_v59 }
 0x11a   : > { %v535_v4 = vmul.f32 %v518_v60, %v2254_v61 }
 0x11b   : > { %v555_v8 = vmul.f32 %v537_v63, %v2251_v59 }
 0x11c   : > { %v533_v3 = vpop.permute.xlu1 %532  ;;  %v553_v11 = vmul.f32 %v535_v4, %v2254_v61 }
 0x11d   : > { %v538_v5 = vmul.f32 %v533_v3, %v2257_v62  ;;  %v523_v6 = vpop.permute.xlu0 %522 }
 0x11e   : > { %v536_v7 = vmul.f32 %v523_v6, %v2261_v1 }
 0x11f   : > { %v546_v9 = vadd.f32 %v538_v5, %v537_v63  ;;  %v556_v10 = vmul.f32 %v538_v5, %v2257_v62 }
 0x120   : > { %v539_v12 = vadd.f32 %v536_v7, %v535_v4  ;;  %v554_v13 = vmul.f32 %v536_v7, %v2261_v1 }
 0x121   : > { %v547_v14 = vrot.slane %v546_v9, 4  ;;  %v564_v15 = vadd.f32 %v556_v10, %v555_v8  ;;  %v826_v10 = vpack.c.bf16 %v2261_v1, %v2254_v61 }
 0x122   : > { %v540_v16 = vrot.slane %v539_v12, 4  ;;  %v557_v17 = vadd.f32 %v554_v13, %v553_v11  ;;  %v1713_v13 = vld [vmem:[#allocation5 + $0x28] sm:$0xff]  }
 0x123   : > { %v548_v18 = vadd.f32 %v547_v14, %v546_v9  ;;  %v565_v19 = vrot.slane %v564_v15, 4  ;;  %v1714_v14 = vld [vmem:[#allocation5 + $0x20] sm:$0xff]  }
 0x124   : > { %v541_v20 = vadd.f32 %v540_v16, %v539_v12  ;;  %v558_v21 = vrot.slane %v557_v17, 4  ;;  %v1712_v12 = vld [vmem:[#allocation5 + $0x30] sm:$0xff]  }
 0x125   : > { %v549_v22 = vrot.slane %v548_v18, 2  ;;  %v566_v23 = vadd.f32 %v565_v19, %v564_v15  ;;  %v1715_v15 = vld [vmem:[#allocation5 + $0x18] sm:$0xff]   ;;  %v1716_v16 = vld [vmem:[#allocation5 + $0x10] sm:$0xff]  }
 0x126   : > { %v542_v24 = vrot.slane %v541_v20, 2  ;;  %v559_v25 = vadd.f32 %v558_v21, %v557_v17  ;;  %v1717_v17 = vld [vmem:[#allocation5 + $0x8] sm:$0xff]   ;;  %v1719_v19 = vld [vmem:[#allocation10 + $0x38] sm:$0xff]  }
 0x127   : > { %v550_v26 = vadd.f32 %v549_v22, %v548_v18  ;;  %v567_v27 = vrot.slane %v566_v23, 2  ;;  %v1718_v18 = vld [vmem:[#allocation5] sm:$0xff]   ;;  %1576 = vmatprep.subr.bf16.mxu1 %v1719_v19  ;;  %v1721_v21 = vld [vmem:[#allocation10 + $0x28] sm:$0xff]  }
 0x128   : > { %v543_v28 = vadd.f32 %v542_v24, %v541_v20  ;;  %v560_v29 = vrot.slane %v559_v25, 2  ;;  %v1720_v20 = vld [vmem:[#allocation10 + $0x30] sm:$0xff]   ;;  %v1722_v22 = vld [vmem:[#allocation10 + $0x20] sm:$0xff]  }
 0x129   : > { %v551_v30 = vrot.slane %v550_v26, 1  ;;  %v568_v31 = vadd.f32 %v567_v27, %v566_v23  ;;  %v1723_v23 = vld [vmem:[#allocation10 + $0x18] sm:$0xff]   ;;  %v1724_v24 = vld [vmem:[#allocation10 + $0x10] sm:$0xff]  }
 0x12a   : > { %v544_v32 = vrot.slane %v543_v28, 1  ;;  %v561_v33 = vadd.f32 %v560_v29, %v559_v25  ;;  %v1725_v25 = vld [vmem:[#allocation10 + $0x8] sm:$0xff]  }
 0x12b   : > { %v552_v34 = vadd.f32 %v551_v30, %v550_v26  ;;  %v569_v35 = vrot.slane %v568_v31, 1  ;;  %v1726_v26 = vld [vmem:[#allocation10] sm:$0xff]  }
 0x12c   : > { %v545_v36 = vadd.f32 %v544_v32, %v543_v28  ;;  %v562_v37 = vrot.slane %v561_v33, 1 }
 0x12d   : > { %v570_v38 = vadd.f32 %v569_v35, %v568_v31  ;;  %v572_v39 = vmul.f32 %v552_v34, %v552_v34  ;;  %v592_v40 = vpack.c.bf16 %v552_v34, %v552_v34  ;;  %v1977_v35 = vmov 1966171168  }
 0x12e   : > { %v563_v41 = vadd.f32 %v562_v37, %v561_v33  ;;  %v571_v42 = vmul.f32 %v545_v36, %v545_v36  ;;  %v591_v43 = vpack.c.bf16 %v545_v36, %v545_v36  ;;  %v943_v36 = vunpack.c.l.s4 %v1977_v35 }
 0x12f   : > { %v574_v44 = vsub.f32 %v570_v38, %v572_v39  ;;  %v726_v45 = vunpack.c.l.b16 %v592_v40  ;;  %v1448_v39 = vld [vmem:[%s2374_s5] ss:$0 sm:$0xff] }
 0x130   : > { %v573_v46 = vsub.f32 %v563_v41, %v571_v42  ;;  %v725_v47 = vunpack.c.l.b16 %v591_v43  ;;  %v944_v38 = vunpack.c.0.s8 %v943_v36 }
 0x131   : > { %v576_v48 = vmax.f32 %v574_v44, 1e-10 }
 0x132   : > { %v575_v49 = vmax.f32 %v573_v46, 1e-10  ;;  %v727_v50 = vsel %vm631_vm10, %v726_v45, %v725_v47  ;;  %v947_v41 = vsub.s32 %v944_v38, %v2213_v2  ;;  %v966_v45 = vsub.s32 0, %v2213_v2 }
 0x133   : > { %v728_v51 = vpack.c.b16 %v727_v50, %v727_v50  ;;  %1731 = vrsqrt.f32 %v576_v48  ;;  %vm586_vm11 = vcmp.eq.f32.partialorder %v576_v48, inf  ;;  %v589_v56 = vand.u32 2147483648, %v576_v48 }
 0x134   : > { %1733 = vrsqrt.f32 %v575_v49  ;;  %vm579_vm12 = vcmp.eq.f32.partialorder %v575_v49, inf  ;;  %v582_v58 = vand.u32 2147483648, %v575_v49  ;;  %vm588_vm13 = vcmp.eq.f32.partialorder %v576_v48, 0.0 }
 0x135   : > { %1553 = vmatmul.mubr.bf16.vlgmr.msra.gmra.mxu1 %v728_v51  ;;  %vm581_vm14 = vcmp.eq.f32.partialorder %v575_v49, 0.0 }
 0x136   : > { %1577 = vmatpush3.bf16.msra.mxu1 %v1719_v19  ;;  %v1144_v19 = vpop.permute.xlu0 %1143 }
 0x137   : > { %1578 = vmatprep.subr.bf16.mxu1 %v1720_v20  ;;  %vm1154_vm2 = vcmp.eq.s32.totalorder %v1144_v19, 1 }
 0x13a   : > { %1579 = vmatpush3.bf16.msra.mxu1 %v1720_v20 }
 0x13b   : > { %1580 = vmatprep.subr.bf16.mxu1 %v1721_v21 }
 0x13e   : > { %1581 = vmatpush3.bf16.msra.mxu1 %v1721_v21  ;;  %v1467_v21 = vld [vmem:[%s2378_s9] ss:$0 sm:$0xff] }
 0x13f   : > { %1582 = vmatprep.subr.bf16.mxu1 %v1722_v22 }
 0x140   : > { %v1732_v52 = vpop.eup %1731 }
 0x141   : > { %v1734_v53 = vpop.eup %1733  ;;  %v585_v54 = vmul.f32 %v1732_v52, %v576_v48 }
 0x142   : > { %v578_v55 = vmul.f32 %v1734_v53, %v575_v49  ;;  %1583 = vmatpush3.bf16.msra.mxu1 %v1722_v22 }
 0x143   : > { %v587_v60 = vsel %vm586_vm11, %v576_v48, %v585_v54  ;;  %1584 = vmatprep.subr.bf16.mxu1 %v1723_v23 }
 0x144   : > { %v580_v63 = vsel %vm579_vm12, %v575_v49, %v578_v55  ;;  %v590_v4 = vsel %vm588_vm13, %v589_v56, %v587_v60  ;;  %v1457_v55 = vld [vmem:[%s2375_s6] ss:$0 sm:$0xff] }
 0x145   : > { %v583_v3 = vsel %vm581_vm14, %v582_v58, %v580_v63  ;;  %v610_v5 = vpack.c.bf16 %v590_v4, %v590_v4 }
 0x146   : > { %v609_v6 = vpack.c.bf16 %v583_v3, %v583_v3  ;;  %1585 = vmatpush3.bf16.msra.mxu1 %v1723_v23 }
 0x147   : > { %v630_v7 = vunpack.c.l.b16 %v610_v5  ;;  %1586 = vmatprep.subr.bf16.mxu1 %v1724_v24  ;;  %v1458_v5 = vld [vmem:[%s2376_s7] ss:$0 sm:$0xff] }
 0x148   : > { %v629_v8 = vunpack.c.l.b16 %v609_v6 }
 0x14a   : > { %v632_v9 = vsel %vm631_vm10, %v630_v7, %v629_v8  ;;  %1587 = vmatpush3.bf16.msra.mxu1 %v1724_v24  ;;  %v1150_v24 = vpop.permute.xlu0 %1149 }
 0x14b   : > { %v633_v11 = vpack.c.b16 %v632_v9, %v632_v9  ;;  %1588 = vmatprep.subr.bf16.mxu1 %v1725_v25  ;;  %vm1156_vm0 = vcmp.eq.s32.totalorder %v1150_v24, 1 }
 0x14d   : > { %1533 = vmatmul.mubr.bf16.vlgmr.msra.gmra.mxu0 %v633_v11 }
 0x14e   : > { %1557 = vmatpush3.bf16.msra.mxu0 %v2247_v57  ;;  %1572 = vmatprep.mubr.bf16.mxu0 %v826_v10  ;;  %v827_v57 = vpack.c.bf16 %v2257_v62, %v2251_v59 }
 0x14f   : > { %1558 = vmatprep.subr.bf16.mxu0 %v1712_v12  ;;  %1589 = vmatpush3.bf16.msra.mxu1 %v1725_v25 }
 0x150   : > { %1590 = vmatprep.subr.bf16.mxu1 %v1726_v26 }
 0x152   : > { %1559 = vmatpush3.bf16.msra.mxu0 %v1712_v12 }
 0x153   : > { %1560 = vmatprep.subr.bf16.mxu0 %v1713_v13  ;;  %1591 = vmatpush3.bf16.msra.mxu1 %v1726_v26 }
 0x156   : > { %1561 = vmatpush3.bf16.msra.mxu0 %v1713_v13 }
 0x157   : > { %1562 = vmatprep.subr.bf16.mxu0 %v1714_v14 }
 0x15a   : > { %1563 = vmatpush3.bf16.msra.mxu0 %v1714_v14 }
 0x15b   : > { %1564 = vmatprep.subr.bf16.mxu0 %v1715_v15 }
 0x15e   : > { %1565 = vmatpush3.bf16.msra.mxu0 %v1715_v15 }
 0x15f   : > { %1566 = vmatprep.subr.bf16.mxu0 %v1716_v16 }
 0x162   : > { %1567 = vmatpush3.bf16.msra.mxu0 %v1716_v16 }
 0x163   : > { %1568 = vmatprep.subr.bf16.mxu0 %v1717_v17 }
 0x166   : > { %1569 = vmatpush3.bf16.msra.mxu0 %v1717_v17 }
 0x167   : > { %1570 = vmatprep.subr.bf16.mxu0 %v1718_v18 }
 0x16a   : > { %1571 = vmatpush3.bf16.msra.mxu0 %v1718_v18 }
 0x16d   : > { %1573 = vmatmul.mubr.bf16.vlgmr.msra.gmra.mxu0 %v827_v57  ;;  %v1147_v57 = vpop.permute.xlu1 %1146 }
 0x16e   : > { %vm1155_vm1 = vcmp.eq.s32.totalorder %v1147_v57, 1 }
 0x171   : > { %v1153_v23 = vpop.permute.xlu1 %1152 }
 0x172   : > { %vm1157_vm15 = vcmp.eq.s32.totalorder %v1153_v23, 1 }
 0x1f5   : > { %v812_v27 = vpop.f32.mrf.mxu1 }
 0x1f7   : > { %v1554_v28 = vpop.f32.mrf.mxu1 }
 0x1f9   : > { %v815_v29 = vpop.f32.mrf.mxu1 }
 0x1fb   : > { %v1555_v30 = vpop.f32.mrf.mxu1 }
 0x20d   : > { %v717_v31 = vpop.f32.mrf.mxu0 }
 0x20e   : > { %v813_v37 = vadd.f32 %v812_v27, %v717_v31 }
 0x20f   : > { %v1534_v32 = vpop.f32.mrf.mxu0 }
 0x210   : > { %v825_v40 = vadd.f32 %v1448_v39, %v813_v37 }
 0x211   : > { %v720_v33 = vpop.f32.mrf.mxu0 }
 0x212   : > { %v948_v42 = vrot.slane %v825_v40, %v947_v41 }
 0x213   : > { %v1535_v34 = vpop.f32.mrf.mxu0 }
 0x214   : > { %v949_v43 = vcombine.high %v948_v42, %v948_v42  ;;  %v956_v46 = vrot.slane %v948_v42, %v947_v41 }
 0x216   : > { %v963_v44 = vrot.slane %v949_v43, %v947_v41  ;;  %v967_v50 = vrot.slane %v956_v46, %v966_v45 }
 0x218   : > { %v971_v47 = vrot.slane %v963_v44, %v966_v45 }
 0x22d   : > { %v1574_v48 = vpop.f32.mrf.mxu0 }
 0x22e   : > { %v976_v49 = vadd.f32 %v1574_v48, %v971_v47 }
 0x22f   : > { %v926_v51 = vpop.f32.mrf.mxu0 }
 0x230   : > { %v974_v52 = vadd.f32 %v967_v50, %v926_v51  ;;  %v980_v53 = vmax.f32 %v976_v49, 0.0 }
 0x231   : > { %v1575_v54 = vpop.f32.mrf.mxu0 }
 0x232   : > { %v978_v56 = vmax.f32 %v974_v52, 0.0  ;;  %v977_v58 = vadd.f32 %v1575_v54, %v971_v47  ;;  %v991_v2 = vmul.f32 %v1457_v55, %v980_v53 }
 0x233   : > { %v929_v60 = vpop.f32.mrf.mxu0 }
 0x234   : > { %v989_v63 = vmul.f32 %v1457_v55, %v978_v56  ;;  %v981_v4 = vmax.f32 %v977_v58, 0.0  ;;  %v975_v3 = vadd.f32 %v967_v50, %v929_v60  ;;  %v1002_v11 = vadd.f32 %v1458_v5, %v991_v2 }
 0x236   : > { %v1000_v6 = vadd.f32 %v1458_v5, %v989_v63  ;;  %v992_v7 = vmul.f32 %v1457_v55, %v981_v4  ;;  %v979_v8 = vmax.f32 %v975_v3, 0.0 }
 0x238   : > { %v1003_v9 = vadd.f32 %v1458_v5, %v992_v7  ;;  %v990_v10 = vmul.f32 %v1457_v55, %v979_v8  ;;  %1735 = vtanh.f32 %v1000_v6 }
 0x23a   : > { %v1001_v12 = vadd.f32 %v1458_v5, %v990_v10  ;;  %1737 = vtanh.f32 %v1003_v9 }
 0x23c   : > { %1739 = vtanh.f32 %v1001_v12 }
 0x23d   : > { %1741 = vtanh.f32 %v1002_v11 }
 0x245   : > { %v1736_v13 = vpop.eup %1735 }
 0x247   : > { %v1738_v14 = vpop.eup %1737 }
 0x249   : > { %v1740_v15 = vpop.eup %1739 }
 0x24a   : > { %v1742_v16 = vpop.eup %1741  ;;  %v1008_v17 = vpack.c.bf16 %v1740_v15, %v1736_v13 }
 0x24b   : > { %v1009_v18 = vpack.c.bf16 %v1738_v14, %v1742_v16 }
 0x24c   : > { %1592 = vmatprep.mubr.bf16.mxu1 %v1008_v17 }
 0x24d   : > { %1593 = vmatmul.mubr.bf16.vlgmr.msra.gmra.mxu1 %v1009_v18 }
 0x30d   : > { %v1594_v20 = vpop.f32.mrf.mxu1 }
 0x30e   : > { %v1132_v25 = vadd.f32 %v1594_v20, %v1467_v21 }
 0x30f   : > { %v1108_v22 = vpop.f32.mrf.mxu1 }
 0x310   : > { %v1130_v27 = vadd.f32 %v1467_v21, %v1108_v22  ;;  %v1160_v30 = vsel %vm1156_vm0, %v1132_v25, -inf }
 0x311   : > { %v1595_v26 = vpop.f32.mrf.mxu1 }
 0x312   : > { %v1133_v28 = vadd.f32 %v1595_v26, %v1467_v21  ;;  %v1158_v34 = vsel %vm1154_vm2, %v1130_v27, -inf }
 0x313   : > { %v1111_v29 = vpop.f32.mrf.mxu1 }
 0x314   : > { %v1161_v31 = vsel %vm1157_vm15, %v1133_v28, -inf  ;;  %v1131_v32 = vadd.f32 %v1467_v21, %v1111_v29 }
 0x315   : > { %v1169_v33 = vmax.f32 %v1160_v30, %v1161_v31 }
 0x316   : > { %v1159_v35 = vsel %vm1155_vm1, %v1131_v32, -inf }
 0x317   : > { %v1170_v36 = vrot.slane %v1169_v33, 4  ;;  %v1162_v37 = vmax.f32 %v1158_v34, %v1159_v35 }
 0x319   : > { %v1171_v38 = vmax.f32 %v1169_v33, %v1170_v36  ;;  %v1163_v39 = vrot.slane %v1162_v37, 4 }
 0x31b   : > { %v1172_v40 = vrot.slane %v1171_v38, 2  ;;  %v1164_v41 = vmax.f32 %v1162_v37, %v1163_v39 }
 0x31d   : > { %v1173_v42 = vmax.f32 %v1171_v38, %v1172_v40  ;;  %v1165_v43 = vrot.slane %v1164_v41, 2 }
 0x31f   : > { %v1174_v44 = vrot.slane %v1173_v42, 1  ;;  %v1166_v45 = vmax.f32 %v1164_v41, %v1165_v43 }
 0x321   : > { %v1175_v46 = vmax.f32 %v1173_v42, %v1174_v44  ;;  %v1167_v47 = vrot.slane %v1166_v45, 1 }
 0x323   : > { %v1178_v48 = vsub.f32 %v1160_v30, %v1175_v46  ;;  %v1179_v49 = vsub.f32 %v1161_v31, %v1175_v46  ;;  %v1168_v50 = vmax.f32 %v1166_v45, %v1167_v47 }
 0x325   : > { %v1184_v51 = vmul.f32 1.442695, %v1178_v48  ;;  %v1186_v52 = vmul.f32 1.442695, %v1179_v49  ;;  %v1176_v53 = vsub.f32 %v1158_v34, %v1168_v50  ;;  %v1177_v54 = vsub.f32 %v1159_v35, %v1168_v50 }
 0x327   : > { %1743 = vpow2.f32 %v1184_v51  ;;  %v1180_v55 = vmul.f32 1.442695, %v1176_v53  ;;  %v1182_v56 = vmul.f32 1.442695, %v1177_v54 }
 0x328   : > { %1745 = vpow2.f32 %v1186_v52 }
 0x329   : > { %1747 = vpow2.f32 %v1180_v55 }
 0x32a   : > { %1749 = vpow2.f32 %v1182_v56 }
 0x334   : > { %v1744_v58 = vpop.eup %1743 }
 0x335   : > { %v1746_v60 = vpop.eup %1745 }
 0x336   : > { %v1748_v63 = vpop.eup %1747  ;;  %v1195_v4 = vadd.f32 %v1746_v60, %v1744_v58 }
 0x337   : > { %v1750_v3 = vpop.eup %1749 }
 0x338   : > { %v1196_v2 = vrot.slane %v1195_v4, 4  ;;  %v1188_v5 = vadd.f32 %v1750_v3, %v1748_v63 }
 0x33a   : > { %v1197_v6 = vadd.f32 %v1196_v2, %v1195_v4  ;;  %v1189_v7 = vrot.slane %v1188_v5, 4 }
 0x33c   : > { %v1198_v8 = vrot.slane %v1197_v6, 2  ;;  %v1190_v9 = vadd.f32 %v1189_v7, %v1188_v5 }
 0x33e   : > { %v1199_v10 = vadd.f32 %v1198_v8, %v1197_v6  ;;  %v1191_v11 = vrot.slane %v1190_v9, 2 }
 0x340   : > { %v1200_v12 = vrot.slane %v1199_v10, 1  ;;  %v1192_v13 = vadd.f32 %v1191_v11, %v1190_v9 }
 0x342   : > { %v1201_v14 = vadd.f32 %v1200_v12, %v1199_v10  ;;  %v1193_v15 = vrot.slane %v1192_v13, 1 }
 0x344   : > { %1751 = vrcp.f32 %v1201_v14  ;;  %v1194_v16 = vadd.f32 %v1193_v15, %v1192_v13 }
 0x346   : > { %1753 = vrcp.f32 %v1194_v16 }
 0x351   : > { %v1752_v17 = vpop.eup %1751 }
 0x352   : > { %v1206_v18 = vmul.f32 %v1752_v17, %v1744_v58  ;;  %v1207_v57 = vmul.f32 %v1752_v17, %v1746_v60 }
 0x353   : > { %v1754_v19 = vpop.eup %1753 }
 0x354   : > { %v1210_v20 = vmul.f32 %v1206_v18, %v2251_v59  ;;  %v1211_v21 = vmul.f32 %v1207_v57, %v2257_v62  ;;  %v1204_v22 = vmul.f32 %v1754_v19, %v1748_v63  ;;  %v1205_v23 = vmul.f32 %v1754_v19, %v1750_v3 }
 0x356   : > { %v1219_v24 = vadd.f32 %v1211_v21, %v1210_v20  ;;  %v1228_v25 = vmul.f32 %v1210_v20, %v2251_v59  ;;  %v1229_v26 = vmul.f32 %v1211_v21, %v2257_v62  ;;  %v1208_v27 = vmul.f32 %v1204_v22, %v2254_v61 }
 0x357   : > { %v1209_v28 = vmul.f32 %v1205_v23, %v2261_v1 }
 0x358   : > { %v1220_v29 = vrot.slane %v1219_v24, 4  ;;  %v1237_v30 = vadd.f32 %v1229_v26, %v1228_v25  ;;  %v1226_v31 = vmul.f32 %v1208_v27, %v2254_v61 }
 0x359   : > { %v1212_v32 = vadd.f32 %v1209_v28, %v1208_v27  ;;  %v1227_v33 = vmul.f32 %v1209_v28, %v2261_v1 }
 0x35a   : > { %v1221_v34 = vadd.f32 %v1220_v29, %v1219_v24  ;;  %v1238_v35 = vrot.slane %v1237_v30, 4 }
 0x35b   : > { %v1213_v36 = vrot.slane %v1212_v32, 4  ;;  %v1230_v37 = vadd.f32 %v1227_v33, %v1226_v31 }
 0x35c   : > { %v1222_v38 = vrot.slane %v1221_v34, 2  ;;  %v1239_v59 = vadd.f32 %v1238_v35, %v1237_v30 }
 0x35d   : > { %v1214_v39 = vadd.f32 %v1213_v36, %v1212_v32  ;;  %v1231_v62 = vrot.slane %v1230_v37, 4 }
 0x35e   : > { %v1223_v40 = vadd.f32 %v1222_v38, %v1221_v34  ;;  %v1240_v41 = vrot.slane %v1239_v59, 2 }
 0x35f   : > { %v1215_v42 = vrot.slane %v1214_v39, 2  ;;  %v1232_v43 = vadd.f32 %v1231_v62, %v1230_v37 }
 0x360   : > { %v1224_v44 = vrot.slane %v1223_v40, 1  ;;  %v1241_v45 = vadd.f32 %v1240_v41, %v1239_v59 }
 0x361   : > { %v1216_v1 = vadd.f32 %v1215_v42, %v1214_v39  ;;  %v1233_v46 = vrot.slane %v1232_v43, 2 }
 0x362   : > { %v1225_v47 = vadd.f32 %v1224_v44, %v1223_v40  ;;  %v1242_v48 = vrot.slane %v1241_v45, 1 }
 0x363   : > { %v1217_v49 = vrot.slane %v1216_v1, 1  ;;  %v1234_v50 = vadd.f32 %v1233_v46, %v1232_v43 }
 0x364   : > { %v1243_v51 = vadd.f32 %v1242_v48, %v1241_v45  ;;  %v1245_v52 = vmul.f32 %v1225_v47, %v1225_v47  ;;  %1269 = vst.msk [vmem:[%s2305_s18 + $0x2] sm:$0x1] %vm2301_vm3, %v1225_v47 }
 0x365   : > { %v1218_v0 = vadd.f32 %v1217_v49, %v1216_v1  ;;  %v1235_v53 = vrot.slane %v1234_v50, 1 }
 0x366   : > { %v1247_v54 = vsub.f32 %v1243_v51, %v1245_v52 }
 0x367   : > { %v1236_v55 = vadd.f32 %v1235_v53, %v1234_v50  ;;  %v1244_v56 = vmul.f32 %v1218_v0, %v1218_v0  ;;  %1268 = vst.msk [vmem:[%s2305_s18] sm:$0x1] %vm2301_vm3, %v1218_v0 }
 0x368   : > { %v1249_v58 = vmax.f32 %v1247_v54, 1e-10 }
 0x369   : > { %v1246_v60 = vsub.f32 %v1236_v55, %v1244_v56 }
 0x36a   : > { %1755 = vrsqrt.f32 %v1249_v58  ;;  %vm1259_vm4 = vcmp.eq.f32.partialorder %v1249_v58, inf  ;;  %v1262_v2 = vand.u32 2147483648, %v1249_v58  ;;  %vm1261_vm5 = vcmp.eq.f32.partialorder %v1249_v58, 0.0 }
 0x36b   : > { %v1248_v63 = vmax.f32 %v1246_v60, 1e-10 }
 0x36d   : > { %1757 = vrsqrt.f32 %v1248_v63  ;;  %vm1252_vm6 = vcmp.eq.f32.partialorder %v1248_v63, inf  ;;  %v1255_v9 = vand.u32 2147483648, %v1248_v63  ;;  %vm1254_vm7 = vcmp.eq.f32.partialorder %v1248_v63, 0.0 }
 0x377   : > { %v1756_v4 = vpop.eup %1755 }
 0x378   : > { %v1258_v3 = vmul.f32 %v1756_v4, %v1249_v58 }
 0x37a   : > { %v1758_v5 = vpop.eup %1757  ;;  %v1260_v6 = vsel %vm1259_vm4, %v1249_v58, %v1258_v3 }
 0x37b   : > { %v1251_v7 = vmul.f32 %v1758_v5, %v1248_v63  ;;  %v1263_v8 = vsel %vm1261_vm5, %v1262_v2, %v1260_v6 }
 0x37c   : > { %1271 = vst.msk [vmem:[%s2305_s18 + $0x3] sm:$0x1] %vm2301_vm3, %v1263_v8 }
 0x37d   : > { %v1253_v10 = vsel %vm1252_vm6, %v1248_v63, %v1251_v7 }
 0x37e   : > { %v1256_v11 = vsel %vm1254_vm7, %v1255_v9, %v1253_v10 }
 0x37f   : > { %1270 = vst.msk [vmem:[%s2305_s18 + $0x1] sm:$0x1] %vm2301_vm3, %v1256_v11 }
 0x380   : > { %1904 = shalt.err (!%p1901_p3)
}
 0x381   : > { %s1905_s3 = scalar_lea.hbm %s2321_s23, 64  ;;  %s1909_s22 = scalar_lea.hbm %s2379_s10, 128 }
 0x382   : > { %p1906_p4 = scmp.ne.s32.totalorder %s2321_s23, %s1905_s3  ;;  %p1910_p9 = scmp.lt.s32.totalorder %s2321_s23, %s2379_s10 }
 0x383   : > { %p1911_p2 = scmp.lt.s32.totalorder %s1909_s22, %s1905_s3 }
 0x384   : > { %p1907_p6 = pnand %p1906_p4, %p2406_p7 }
 0x385   : > { %p1912_p10 = por %p1911_p2, %p1910_p9 }
 0x386   : > { %p1908_p8 = pneg %p1907_p6 }
 0x388   : > { %p1913_p12 = pnand %p1912_p10, %p1908_p8 }
 0x38a   : > { %1916 = shalt.err (!%p1913_p12)
}
 0x38b   : > { %s1979_s21 = smov 32   ;;  %s1980_s28 = smov 2  }
 0x38c   : > { %1614 = dma.vmem_to_hbm [thread:$0]  (%p2406_p7), %s2323_s19, 64, %s2321_s23, %s1273_s17, %s1979_s21, %s1979_s21, %s1980_s28  }
 0x38d PF: > { %s1302_s24 = sand.u32 1, %s1951_s13   ;;  %p2407_p1 = scmp.ne.s32.totalorder %s2389_s20, 0 }
 0x38e   : > { %p2408_p13 = scmp.ge.s32.totalorder %s1963_s16, 2  ;;  %s1303_s25 = scalar_lea.sflag [#allocation4], %s1302_s24 }
 0x390   : > { %p1634_p0 = pnand %p2408_p13, %p2407_p1 }
 0x392   : > { %p1635_p11 = pneg %p1634_p0 }
 0x394   : > { %1946 = dma.done.wait (%p1635_p11), %s1303_s25, 64  }
 0x395   : > { %1948 = vsyncadd (%p1635_p11), %s1303_s25, 4294967232  ;;  %p25_p5 = scmp.ge.s32.totalorder %s2136_s27, 4   ;;  %s2409_s13 = smov %s1955_s14 }
 0x396   : > { %s2410_s14 = smov %s1959_s15  ;;  %s2411_s15 = smov %s2152_s12 }
 0x397   : > { %s2412_s16 = smov %s2136_s27  ;;  %27 = sbr.rel (!%p25_p5) target bundleno = 12 (0xc), region = 124 }
 0x39c   :  { %1308 = vsyncpa [#allocation3], 1 }
 0x39d   :  { %1310 = vsyncpa [#allocation3 + $0x1], 1 }
 0x39e   :  { %1311 = vsyncpa [#allocation6], 1 }
 0x39f   :  { %1312 = vsyncpa [#allocation9], 1 }
 0x3a0   :  { %1313 = vsyncpa [#allocation4], 1 }
 0x3a1   :  { %1315 = vsyncpa [#allocation4 + $0x1], 1 }

</bundles_post_ra>
